<compile_context>
chip_gen: v6e
topology: v6e:2x2x1
jax: 0.10.0
libtpu: 0.0.40
codegen_flags: <defaults>
</compile_context>

<pallas_src>
import functools

import jax
import jax.numpy as jnp
from jax.experimental import pallas as pl
from jax.experimental.pallas import tpu as pltpu


# ---------------------------------------------------------------------------
# Single-shot kernel: whole problem resident in VMEM, one MXU matmul.
# ---------------------------------------------------------------------------
def _matching_kernel_single(feat_ref, table_t_ref, out_ref):
    # features [N, K] @ table^T [K, P] -> scores [N, P], f32 accumulation.
    out_ref[...] = jnp.dot(
        feat_ref[...], table_t_ref[...], preferred_element_type=jnp.float32
    ).astype(out_ref.dtype)


# ---------------------------------------------------------------------------
# Tiled fallback kernel (large N / num_persons): K-reduction with accumulator.
# ---------------------------------------------------------------------------
def _matching_kernel_tiled(feat_ref, table_t_ref, out_ref, acc_ref):
    @pl.when(pl.program_id(2) == 0)
    def _():
        acc_ref[...] = jnp.zeros_like(acc_ref)

    acc_ref[...] += jnp.dot(
        feat_ref[...], table_t_ref[...], preferred_element_type=jnp.float32
    )

    @pl.when(pl.program_id(2) == pl.num_programs(2) - 1)
    def _():
        out_ref[...] = acc_ref[...].astype(out_ref.dtype)


# Footprint threshold under which we take the single-shot path. 16 MiB keeps
# us inside the default scoped-VMEM budget on every generation (v5e's default
# scoped limit is the smallest at 16 MiB).
_SINGLE_SHOT_VMEM_BYTES = 16 * 1024 * 1024


@functools.partial(jax.jit, static_argnames=("tm", "tn", "tk"))
def labeled_matching_scores(features, lookup_table_t, *, tm=256, tn=512, tk=256):
    """scores = features @ lookup_table_t  (lookup_table_t is [feat_len, num_persons])."""
    N, K = features.shape
    K2, P = lookup_table_t.shape
    assert K == K2, "feat_len mismatch"

    itemsize = max(features.dtype.itemsize, lookup_table_t.dtype.itemsize)
    footprint = (N * K + K * P) * itemsize + N * P * 4

    if footprint <= _SINGLE_SHOT_VMEM_BYTES:
        # --- Collapsed grid: one kernel invocation, everything in VMEM. ---
        return pl.pallas_call(
            _matching_kernel_single,
            out_shape=jax.ShapeDtypeStruct((N, P), jnp.float32),
            in_specs=[
                pl.BlockSpec(memory_space=pltpu.MemorySpace.VMEM),
                pl.BlockSpec(memory_space=pltpu.MemorySpace.VMEM),
            ],
            out_specs=pl.BlockSpec(memory_space=pltpu.MemorySpace.VMEM),
        )(features, lookup_table_t)

    # --- Tiled fallback for large shapes. ---
    tm = min(tm, N)
    tn = min(tn, P)
    tk = min(tk, K)
    # Non-divisible shapes would need padding; keep the explicit contract.
    assert N % tm == 0 and P % tn == 0 and K % tk == 0, (
        "tiled path requires N, num_persons, feat_len divisible by (tm, tn, tk)"
    )

    # 2x double-buffered inputs + 2x output + accumulator, in bytes.
    tile_budget = (
        2 * tm * tk * features.dtype.itemsize
        + 2 * tk * tn * lookup_table_t.dtype.itemsize
        + 2 * tm * tn * 4
        + tm * tn * 4
    )
    vmem_limit = min(max(2 * tile_budget, 8 * 1024 * 1024), 32 * 1024 * 1024)

    grid = (N // tm, P // tn, K // tk)
    return pl.pallas_call(
        _matching_kernel_tiled,
        out_shape=jax.ShapeDtypeStruct((N, P), jnp.float32),
        grid_spec=pltpu.PrefetchScalarGridSpec(
            num_scalar_prefetch=0,
            grid=grid,
            in_specs=[
                pl.BlockSpec((tm, tk), lambda i, j, k: (i, k)),  # features
                pl.BlockSpec((tk, tn), lambda i, j, k: (k, j)),  # table^T
            ],
            out_specs=pl.BlockSpec((tm, tn), lambda i, j, k: (i, j)),
            scratch_shapes=[pltpu.VMEM((tm, tn), jnp.float32)],
        ),
        compiler_params=pltpu.CompilerParams(
            dimension_semantics=("parallel", "parallel", "arbitrary"),
            vmem_limit_bytes=vmem_limit,
        ),
    )(features, lookup_table_t)


class LabeledMatchingLayerNormPallas:
    """JAX/Pallas equivalent of the PyTorch LabeledMatchingLayerNorm module."""

    def __init__(self, num_persons=512, feat_len=256, key=None, table_dtype=jnp.float32):
        # PyTorch __init__ registers a zeros buffer [num_persons, feat_len].
        # For a non-degenerate synthetic test we fill it deterministically
        # (row-normalized, as the OIM momentum update keeps it).
        if key is None:
            table = jnp.zeros((num_persons, feat_len), jnp.float32)
        else:
            table = jax.random.normal(key, (num_persons, feat_len), jnp.float32)
            table = table / (jnp.linalg.norm(table, axis=1, keepdims=True) + 1e-12)
        self.lookup_table = table
        # Pre-transpose ONCE so the kernel gets the MXU-native [K, N] weight
        # layout (no per-call RHS transpose). Optionally store as bf16 to
        # halve HBM traffic for large tables; f32 accumulation is kept either
        # way via preferred_element_type.
        self.lookup_table_t = table.T.astype(table_dtype)

    def __call__(self, features, pid_labels):
        # pid_labels is unused in the forward pass (only in the custom backward).
        # TODO(synk): the in-place lookup-table momentum update lives in
        # LabeledMatchingNorm.backward and is not part of this forward kernel.
        del pid_labels
        return labeled_matching_scores(features, self.lookup_table_t)


if __name__ == "__main__":
    key = jax.random.PRNGKey(0)
    k_feat, k_tab, k_lab = jax.random.split(key, 3)

    # Small shapes consistent with the module: N proposals, feat_len, num_persons.
    N, feat_len, num_persons = 16, 256, 512

    features = jax.random.normal(k_feat, (N, feat_len), jnp.float32)
    pid_labels = jax.random.randint(k_lab, (N,), -1, num_persons, jnp.int32)

    layer = LabeledMatchingLayerNormPallas(
        num_persons=num_persons, feat_len=feat_len, key=k_tab
    )

    scores = layer(features, pid_labels)
    scores = jax.block_until_ready(scores)

    # Reference check (plain JAX), same semantics as the PyTorch forward.
    ref = features @ layer.lookup_table.T
    assert scores.shape == (N, num_persons)
    assert jnp.allclose(scores, ref, atol=1e-4, rtol=1e-4)

    print("KERNEL_OK")
</pallas_src>

<mosaic_0001>
module attributes {stable_mosaic.version = 11 : i64} {
  func.func @_matching_kernel_single(%arg0: memref<16x256xf32, #tpu.memory_space<vmem>>, %arg1: memref<256x512xf32, #tpu.memory_space<vmem>>, %arg2: memref<16x512xf32, #tpu.memory_space<vmem>>) attributes {dimension_semantics = [], scalar_prefetch = 0 : i64, scratch_operands = 0 : i64, tpu.core_type = #tpu.core_type<tc>} {
    %c0 = arith.constant 0 : index
    %c0_0 = arith.constant 0 : index
    %0 = vector.load %arg0[%c0, %c0_0] : memref<16x256xf32, #tpu.memory_space<vmem>>, vector<16x256xf32>
    %c0_1 = arith.constant 0 : index
    %c0_2 = arith.constant 0 : index
    %1 = vector.load %arg1[%c0_1, %c0_2] : memref<256x512xf32, #tpu.memory_space<vmem>>, vector<256x512xf32>
    %cst = arith.constant dense<0.000000e+00> : vector<16x512xf32>
    %2 = tpu.matmul %0, %1, %cst {dimension_numbers = #tpu.dot_dimension_numbers<[1], [0], [0], [1], [0, 0, 1, 1], [], []>} : vector<16x256xf32>, vector<256x512xf32>, vector<16x512xf32> -> vector<16x512xf32>
    %c0_3 = arith.constant 0 : index
    %c0_4 = arith.constant 0 : index
    %3 = vector.load %arg2[%c0_3, %c0_4] : memref<16x512xf32, #tpu.memory_space<vmem>>, vector<16x512xf32>
    tpu.vector_store %arg2[%c0_3, %c0_4], %2 {strides = array<i32>} : memref<16x512xf32, #tpu.memory_space<vmem>>, vector<16x512xf32>,
    return
  }
}

</mosaic_0001>

<bundles_post_ra>
// kernel: labeled_matching_scores.1
= control target key start
LH: loop header
LB: loop body
LE: loop exit
PB: predicated region body
PF: predicated region fallthrough
CT: control target
= control target key end

     0   :  { %7 = vsyncpa [#allocation3], 0  ;;  %s462_s0 = inlined_call_operand.hbm [shape: f32[16,256], index: 0, kind: input, shape index: {}]   ;;  %s463_s1 = inlined_call_operand.hbm [shape: f32[256,512], index: 1, kind: input, shape index: {}]   ;;  %s464_s2 = inlined_call_operand.hbm [shape: f32[16,512], index: 2, kind: output, shape index: {}]  }
   0x1   :  { %8 = vsyncpa [#allocation6], 0 }
   0x2   :  { %9 = vsyncpa [#allocation4], 0  ;;  %s425_s9 = smov [#allocation2]  }
   0x3   :  { %s15_s10 = sshll.u32 %s425_s9, 4  ;;  %s16_s10 = int_to_ptr.vmem [resolvable:$true] %s15_s10 }
   0x4   :  { %s367_s11 = scalar_lea.vmem %s16_s10, 512  ;;  %p372_p1 = scmp.lt.s32.totalorder %s16_s10, %s16_s10 }
   0x5   :  { %p368_p0 = scmp.ne.s32.totalorder %s16_s10, %s367_s11  ;;  %p373_p2 = scmp.lt.s32.totalorder %s367_s11, %s367_s11 }
   0x7   :  { %p374_p3 = por %p373_p2, %p372_p1 }
   0x9   :  { %p375_p4 = pnand %p374_p3, %p368_p0 }
   0xb   :  { %378 = shalt.err (!%p375_p4)
}
   0xc   :  { %s426_s12 = smov 256   ;;  %s427_s13 = smov 16  }
   0xd   :  { %21 = dma.hbm_to_vmem [thread:$0]  %s462_s0, 512, %s16_s10, [#allocation3], %s426_s12, %s426_s12, %s427_s13  }
   0xe   :  { %s428_s16 = smov [#allocation5]  }
   0xf   :  { %s27_s17 = sshll.u32 %s428_s16, 4  ;;  %s28_s17 = int_to_ptr.vmem [resolvable:$true] %s27_s17 }
  0x10   :  { %s387_s18 = scalar_lea.vmem %s28_s17, 16384  ;;  %p392_p6 = scmp.lt.s32.totalorder %s28_s17, %s28_s17 }
  0x11   :  { %p388_p5 = scmp.ne.s32.totalorder %s28_s17, %s387_s18  ;;  %p393_p7 = scmp.lt.s32.totalorder %s387_s18, %s387_s18 }
  0x13   :  { %p394_p8 = por %p393_p7, %p392_p6 }
  0x15   :  { %p395_p9 = pnand %p394_p8, %p388_p5 }
  0x17   :  { %398 = shalt.err (!%p395_p9)
}
  0x18   :  { %s429_s19 = smov 512   ;;  %s430_s20 = smov 32  }
  0x19   :  { %33 = dma.hbm_to_vmem [thread:$0]  %s463_s1, 16384, %s28_s17, [#allocation6], %s429_s19, %s429_s19, %s430_s20  }
  0x1a   :  { %419 = dma.done.wait [#allocation3], 512  }
  0x1b   :  { %420 = vsyncadd [#allocation3], 4294966784 }
  0x1c   :  { %421 = dma.done.wait [#allocation6], 16384  }
  0x1d   :  { %422 = vsyncadd [#allocation6], 4294950912  ;;  %v105_v0 = vld [vmem:[#allocation5 + $0x1e8] sm:$0xff]  ;;  %v107_v1 = vld [vmem:[#allocation5 + $0x1f8] sm:$0xff]  ;;  %s431_s0 = smov [#allocation7]  }
  0x1e   :  { %v104_v2 = vld [vmem:[#allocation5 + $0x1e0] sm:$0xff]  ;;  %172 = vmatprep.subr.mxu0 %v105_v0  ;;  %249 = vmatprep.subr.mxu1 %v107_v1  ;;  %v106_v3 = vld [vmem:[#allocation5 + $0x1f0] sm:$0xff]  ;;  %v101_v4 = vld [vmem:[#allocation5 + $0x1c8] sm:$0xff]  ;;  %s339_s1 = sshll.u32 %s431_s0, 4  ;;  %s340_s1 = int_to_ptr.vmem [resolvable:$true] %s339_s1 }
  0x1f   :  { %v103_v5 = vld [vmem:[#allocation5 + $0x1d8] sm:$0xff]  ;;  %173 = vmatpush1.msra.mxu0 %v104_v2  ;;  %250 = vmatpush1.msra.mxu1 %v106_v3  ;;  %v100_v6 = vld [vmem:[#allocation5 + $0x1c0] sm:$0xff]  ;;  %v102_v7 = vld [vmem:[#allocation5 + $0x1d0] sm:$0xff]  ;;  %s399_s23 = scalar_lea.vmem %s340_s1, 1024  ;;  %p404_p11 = scmp.lt.s32.totalorder %s340_s1, %s340_s1 }
  0x20   :  { %v97_v8 = vld [vmem:[#allocation5 + $0x1a8] sm:$0xff]  ;;  %174 = vmatprep.subr.mxu0 %v101_v4  ;;  %251 = vmatprep.subr.mxu1 %v103_v5  ;;  %v99_v9 = vld [vmem:[#allocation5 + $0x1b8] sm:$0xff]  ;;  %v96_v10 = vld [vmem:[#allocation5 + $0x1a0] sm:$0xff]  ;;  %p400_p10 = scmp.ne.s32.totalorder %s340_s1, %s399_s23  ;;  %p405_p12 = scmp.lt.s32.totalorder %s399_s23, %s399_s23 }
  0x21   :  { %v98_v11 = vld [vmem:[#allocation5 + $0x1b0] sm:$0xff]  ;;  %175 = vmatpush1.msra.mxu0 %v100_v6  ;;  %252 = vmatpush1.msra.mxu1 %v102_v7  ;;  %v93_v12 = vld [vmem:[#allocation5 + $0x188] sm:$0xff]  ;;  %v95_v13 = vld [vmem:[#allocation5 + $0x198] sm:$0xff] }
  0x22   :  { %176 = vmatprep.subr.mxu0 %v97_v8  ;;  %253 = vmatprep.subr.mxu1 %v99_v9  ;;  %v92_v14 = vld [vmem:[#allocation5 + $0x180] sm:$0xff]  ;;  %v94_v15 = vld [vmem:[#allocation5 + $0x190] sm:$0xff]  ;;  %v89_v16 = vld [vmem:[#allocation5 + $0x168] sm:$0xff]  ;;  %p406_p13 = por %p405_p12, %p404_p11 }
  0x23   :  { %177 = vmatpush1.msra.mxu0 %v96_v10  ;;  %254 = vmatpush1.msra.mxu1 %v98_v11  ;;  %v91_v17 = vld [vmem:[#allocation5 + $0x178] sm:$0xff]  ;;  %v88_v18 = vld [vmem:[#allocation5 + $0x160] sm:$0xff]  ;;  %v90_v19 = vld [vmem:[#allocation5 + $0x170] sm:$0xff] }
  0x24   :  { %178 = vmatprep.subr.mxu0 %v93_v12  ;;  %255 = vmatprep.subr.mxu1 %v95_v13  ;;  %v85_v20 = vld [vmem:[#allocation5 + $0x148] sm:$0xff]  ;;  %v87_v21 = vld [vmem:[#allocation5 + $0x158] sm:$0xff]  ;;  %v84_v22 = vld [vmem:[#allocation5 + $0x140] sm:$0xff]  ;;  %p407_p0 = pnand %p406_p13, %p400_p10 }
  0x25   :  { %179 = vmatpush1.msra.mxu0 %v92_v14  ;;  %256 = vmatpush1.msra.mxu1 %v94_v15  ;;  %v86_v23 = vld [vmem:[#allocation5 + $0x150] sm:$0xff]  ;;  %v81_v24 = vld [vmem:[#allocation5 + $0x128] sm:$0xff]  ;;  %v83_v25 = vld [vmem:[#allocation5 + $0x138] sm:$0xff] }
  0x26   :  { %180 = vmatprep.subr.mxu0 %v89_v16  ;;  %257 = vmatprep.subr.mxu1 %v91_v17  ;;  %v80_v26 = vld [vmem:[#allocation5 + $0x120] sm:$0xff]  ;;  %v82_v27 = vld [vmem:[#allocation5 + $0x130] sm:$0xff]  ;;  %v77_v28 = vld [vmem:[#allocation5 + $0x108] sm:$0xff] }
  0x27   :  { %181 = vmatpush1.msra.mxu0 %v88_v18  ;;  %258 = vmatpush1.msra.mxu1 %v90_v19  ;;  %v79_v29 = vld [vmem:[#allocation5 + $0x118] sm:$0xff]  ;;  %v76_v30 = vld [vmem:[#allocation5 + $0x100] sm:$0xff]  ;;  %v78_v31 = vld [vmem:[#allocation5 + $0x110] sm:$0xff] }
  0x28   :  { %182 = vmatprep.subr.mxu0 %v85_v20  ;;  %259 = vmatprep.subr.mxu1 %v87_v21  ;;  %v73_v32 = vld [vmem:[#allocation5 + $0xe8] sm:$0xff]  ;;  %v75_v33 = vld [vmem:[#allocation5 + $0xf8] sm:$0xff]  ;;  %v72_v34 = vld [vmem:[#allocation5 + $0xe0] sm:$0xff] }
  0x29   :  { %183 = vmatpush1.msra.mxu0 %v84_v22  ;;  %260 = vmatpush1.msra.mxu1 %v86_v23  ;;  %v74_v35 = vld [vmem:[#allocation5 + $0xf0] sm:$0xff]  ;;  %v69_v36 = vld [vmem:[#allocation5 + $0xc8] sm:$0xff]  ;;  %v71_v37 = vld [vmem:[#allocation5 + $0xd8] sm:$0xff] }
  0x2a   :  { %184 = vmatprep.subr.mxu0 %v81_v24  ;;  %261 = vmatprep.subr.mxu1 %v83_v25  ;;  %v68_v38 = vld [vmem:[#allocation5 + $0xc0] sm:$0xff]  ;;  %v70_v39 = vld [vmem:[#allocation5 + $0xd0] sm:$0xff]  ;;  %v65_v40 = vld [vmem:[#allocation5 + $0xa8] sm:$0xff] }
  0x2b   :  { %185 = vmatpush1.msra.mxu0 %v80_v26  ;;  %262 = vmatpush1.msra.mxu1 %v82_v27  ;;  %v67_v41 = vld [vmem:[#allocation5 + $0xb8] sm:$0xff]  ;;  %v64_v42 = vld [vmem:[#allocation5 + $0xa0] sm:$0xff]  ;;  %v66_v43 = vld [vmem:[#allocation5 + $0xb0] sm:$0xff] }
  0x2c   :  { %186 = vmatprep.subr.mxu0 %v77_v28  ;;  %263 = vmatprep.subr.mxu1 %v79_v29  ;;  %v61_v44 = vld [vmem:[#allocation5 + $0x88] sm:$0xff]  ;;  %v63_v45 = vld [vmem:[#allocation5 + $0x98] sm:$0xff]  ;;  %v60_v46 = vld [vmem:[#allocation5 + $0x80] sm:$0xff] }
  0x2d   :  { %187 = vmatpush1.msra.mxu0 %v76_v30  ;;  %264 = vmatpush1.msra.mxu1 %v78_v31  ;;  %v62_v47 = vld [vmem:[#allocation5 + $0x90] sm:$0xff]  ;;  %v57_v48 = vld [vmem:[#allocation5 + $0x68] sm:$0xff]  ;;  %v59_v49 = vld [vmem:[#allocation5 + $0x78] sm:$0xff] }
  0x2e   :  { %188 = vmatprep.subr.mxu0 %v73_v32  ;;  %265 = vmatprep.subr.mxu1 %v75_v33  ;;  %v56_v50 = vld [vmem:[#allocation5 + $0x60] sm:$0xff]  ;;  %v58_v51 = vld [vmem:[#allocation5 + $0x70] sm:$0xff]  ;;  %v53_v52 = vld [vmem:[#allocation5 + $0x48] sm:$0xff] }
  0x2f   :  { %189 = vmatpush1.msra.mxu0 %v72_v34  ;;  %266 = vmatpush1.msra.mxu1 %v74_v35  ;;  %v55_v53 = vld [vmem:[#allocation5 + $0x58] sm:$0xff]  ;;  %v52_v54 = vld [vmem:[#allocation5 + $0x40] sm:$0xff]  ;;  %v54_v55 = vld [vmem:[#allocation5 + $0x50] sm:$0xff] }
  0x30   :  { %190 = vmatprep.subr.mxu0 %v69_v36  ;;  %267 = vmatprep.subr.mxu1 %v71_v37  ;;  %v49_v56 = vld [vmem:[#allocation5 + $0x28] sm:$0xff]  ;;  %v51_v57 = vld [vmem:[#allocation5 + $0x38] sm:$0xff]  ;;  %v48_v58 = vld [vmem:[#allocation5 + $0x20] sm:$0xff] }
  0x31   :  { %191 = vmatpush1.msra.mxu0 %v68_v38  ;;  %268 = vmatpush1.msra.mxu1 %v70_v39  ;;  %v50_v59 = vld [vmem:[#allocation5 + $0x30] sm:$0xff]  ;;  %v45_v60 = vld [vmem:[#allocation5 + $0x8] sm:$0xff]  ;;  %v47_v61 = vld [vmem:[#allocation5 + $0x18] sm:$0xff] }
  0x32   :  { %192 = vmatprep.subr.mxu0 %v65_v40  ;;  %269 = vmatprep.subr.mxu1 %v67_v41  ;;  %v44_v62 = vld [vmem:[#allocation5] sm:$0xff]  ;;  %v46_v63 = vld [vmem:[#allocation5 + $0x10] sm:$0xff]  ;;  %v169_v0 = vld [vmem:[#allocation5 + $0x3e8] sm:$0xff] }
  0x33   :  { %193 = vmatpush1.msra.mxu0 %v64_v42  ;;  %270 = vmatpush1.msra.mxu1 %v66_v43  ;;  %v171_v1 = vld [vmem:[#allocation5 + $0x3f8] sm:$0xff]  ;;  %v168_v2 = vld [vmem:[#allocation5 + $0x3e0] sm:$0xff]  ;;  %v170_v3 = vld [vmem:[#allocation5 + $0x3f0] sm:$0xff] }
  0x34   :  { %194 = vmatprep.subr.mxu0 %v61_v44  ;;  %271 = vmatprep.subr.mxu1 %v63_v45  ;;  %v165_v4 = vld [vmem:[#allocation5 + $0x3c8] sm:$0xff]  ;;  %v167_v5 = vld [vmem:[#allocation5 + $0x3d8] sm:$0xff]  ;;  %v164_v6 = vld [vmem:[#allocation5 + $0x3c0] sm:$0xff] }
  0x35   :  { %195 = vmatpush1.msra.mxu0 %v60_v46  ;;  %272 = vmatpush1.msra.mxu1 %v62_v47  ;;  %v166_v7 = vld [vmem:[#allocation5 + $0x3d0] sm:$0xff]  ;;  %v161_v8 = vld [vmem:[#allocation5 + $0x3a8] sm:$0xff]  ;;  %v163_v9 = vld [vmem:[#allocation5 + $0x3b8] sm:$0xff] }
  0x36   :  { %196 = vmatprep.subr.mxu0 %v57_v48  ;;  %273 = vmatprep.subr.mxu1 %v59_v49  ;;  %v160_v10 = vld [vmem:[#allocation5 + $0x3a0] sm:$0xff]  ;;  %v162_v11 = vld [vmem:[#allocation5 + $0x3b0] sm:$0xff]  ;;  %v157_v12 = vld [vmem:[#allocation5 + $0x388] sm:$0xff] }
  0x37   :  { %197 = vmatpush1.msra.mxu0 %v56_v50  ;;  %274 = vmatpush1.msra.mxu1 %v58_v51  ;;  %v159_v13 = vld [vmem:[#allocation5 + $0x398] sm:$0xff]  ;;  %v156_v14 = vld [vmem:[#allocation5 + $0x380] sm:$0xff]  ;;  %v158_v15 = vld [vmem:[#allocation5 + $0x390] sm:$0xff] }
  0x38   :  { %198 = vmatprep.subr.mxu0 %v53_v52  ;;  %275 = vmatprep.subr.mxu1 %v55_v53  ;;  %v153_v16 = vld [vmem:[#allocation5 + $0x368] sm:$0xff]  ;;  %v155_v17 = vld [vmem:[#allocation5 + $0x378] sm:$0xff]  ;;  %v152_v18 = vld [vmem:[#allocation5 + $0x360] sm:$0xff] }
  0x39   :  { %199 = vmatpush1.msra.mxu0 %v52_v54  ;;  %276 = vmatpush1.msra.mxu1 %v54_v55  ;;  %v154_v19 = vld [vmem:[#allocation5 + $0x370] sm:$0xff]  ;;  %v149_v20 = vld [vmem:[#allocation5 + $0x348] sm:$0xff]  ;;  %v151_v21 = vld [vmem:[#allocation5 + $0x358] sm:$0xff] }
  0x3a   :  { %200 = vmatprep.subr.mxu0 %v49_v56  ;;  %277 = vmatprep.subr.mxu1 %v51_v57  ;;  %v148_v22 = vld [vmem:[#allocation5 + $0x340] sm:$0xff]  ;;  %v150_v23 = vld [vmem:[#allocation5 + $0x350] sm:$0xff]  ;;  %v145_v24 = vld [vmem:[#allocation5 + $0x328] sm:$0xff] }
  0x3b   :  { %201 = vmatpush1.msra.mxu0 %v48_v58  ;;  %278 = vmatpush1.msra.mxu1 %v50_v59  ;;  %v147_v25 = vld [vmem:[#allocation5 + $0x338] sm:$0xff]  ;;  %v144_v26 = vld [vmem:[#allocation5 + $0x320] sm:$0xff]  ;;  %v146_v27 = vld [vmem:[#allocation5 + $0x330] sm:$0xff] }
  0x3c   :  { %202 = vmatprep.subr.mxu0 %v45_v60  ;;  %279 = vmatprep.subr.mxu1 %v47_v61  ;;  %v141_v28 = vld [vmem:[#allocation5 + $0x308] sm:$0xff]  ;;  %v143_v29 = vld [vmem:[#allocation5 + $0x318] sm:$0xff]  ;;  %v140_v30 = vld [vmem:[#allocation5 + $0x300] sm:$0xff] }
  0x3d   :  { %203 = vmatpush1.msra.mxu0 %v44_v62  ;;  %280 = vmatpush1.msra.mxu1 %v46_v63  ;;  %v142_v31 = vld [vmem:[#allocation5 + $0x310] sm:$0xff]  ;;  %v137_v32 = vld [vmem:[#allocation5 + $0x2e8] sm:$0xff]  ;;  %v139_v33 = vld [vmem:[#allocation5 + $0x2f8] sm:$0xff] }
  0x3e   :  { %204 = vmatprep.subr.mxu0 %v169_v0  ;;  %281 = vmatprep.subr.mxu1 %v171_v1  ;;  %v136_v34 = vld [vmem:[#allocation5 + $0x2e0] sm:$0xff]  ;;  %v138_v35 = vld [vmem:[#allocation5 + $0x2f0] sm:$0xff]  ;;  %v133_v36 = vld [vmem:[#allocation5 + $0x2c8] sm:$0xff] }
  0x3f   :  { %205 = vmatpush2.msra.mxu0 %v168_v2  ;;  %282 = vmatpush2.msra.mxu1 %v170_v3  ;;  %v135_v37 = vld [vmem:[#allocation5 + $0x2d8] sm:$0xff]  ;;  %v132_v38 = vld [vmem:[#allocation5 + $0x2c0] sm:$0xff]  ;;  %v134_v39 = vld [vmem:[#allocation5 + $0x2d0] sm:$0xff] }
  0x40   :  { %206 = vmatprep.subr.mxu0 %v165_v4  ;;  %283 = vmatprep.subr.mxu1 %v167_v5  ;;  %v129_v40 = vld [vmem:[#allocation5 + $0x2a8] sm:$0xff]  ;;  %v131_v41 = vld [vmem:[#allocation5 + $0x2b8] sm:$0xff]  ;;  %v128_v42 = vld [vmem:[#allocation5 + $0x2a0] sm:$0xff] }
  0x41   :  { %207 = vmatpush2.msra.mxu0 %v164_v6  ;;  %284 = vmatpush2.msra.mxu1 %v166_v7  ;;  %v130_v43 = vld [vmem:[#allocation5 + $0x2b0] sm:$0xff]  ;;  %v125_v44 = vld [vmem:[#allocation5 + $0x288] sm:$0xff]  ;;  %v127_v45 = vld [vmem:[#allocation5 + $0x298] sm:$0xff] }
  0x42   :  { %208 = vmatprep.subr.mxu0 %v161_v8  ;;  %285 = vmatprep.subr.mxu1 %v163_v9  ;;  %v124_v46 = vld [vmem:[#allocation5 + $0x280] sm:$0xff]  ;;  %v126_v47 = vld [vmem:[#allocation5 + $0x290] sm:$0xff]  ;;  %v121_v48 = vld [vmem:[#allocation5 + $0x268] sm:$0xff] }
  0x43   :  { %209 = vmatpush2.msra.mxu0 %v160_v10  ;;  %286 = vmatpush2.msra.mxu1 %v162_v11  ;;  %v123_v49 = vld [vmem:[#allocation5 + $0x278] sm:$0xff]  ;;  %v120_v50 = vld [vmem:[#allocation5 + $0x260] sm:$0xff]  ;;  %v122_v51 = vld [vmem:[#allocation5 + $0x270] sm:$0xff] }
  0x44   :  { %210 = vmatprep.subr.mxu0 %v157_v12  ;;  %287 = vmatprep.subr.mxu1 %v159_v13  ;;  %v117_v52 = vld [vmem:[#allocation5 + $0x248] sm:$0xff]  ;;  %v119_v53 = vld [vmem:[#allocation5 + $0x258] sm:$0xff]  ;;  %v116_v54 = vld [vmem:[#allocation5 + $0x240] sm:$0xff] }
  0x45   :  { %211 = vmatpush2.msra.mxu0 %v156_v14  ;;  %288 = vmatpush2.msra.mxu1 %v158_v15  ;;  %v118_v55 = vld [vmem:[#allocation5 + $0x250] sm:$0xff]  ;;  %v113_v56 = vld [vmem:[#allocation5 + $0x228] sm:$0xff]  ;;  %v115_v57 = vld [vmem:[#allocation5 + $0x238] sm:$0xff] }
  0x46   :  { %212 = vmatprep.subr.mxu0 %v153_v16  ;;  %289 = vmatprep.subr.mxu1 %v155_v17  ;;  %v112_v58 = vld [vmem:[#allocation5 + $0x220] sm:$0xff]  ;;  %v114_v59 = vld [vmem:[#allocation5 + $0x230] sm:$0xff]  ;;  %v109_v60 = vld [vmem:[#allocation5 + $0x208] sm:$0xff] }
  0x47   :  { %213 = vmatpush2.msra.mxu0 %v152_v18  ;;  %290 = vmatpush2.msra.mxu1 %v154_v19  ;;  %v111_v61 = vld [vmem:[#allocation5 + $0x218] sm:$0xff]  ;;  %v108_v62 = vld [vmem:[#allocation5 + $0x200] sm:$0xff]  ;;  %v41_v63 = vld [vmem:[#allocation2 + $0x8] sm:$0xff] }
  0x48   :  { %214 = vmatprep.subr.mxu0 %v149_v20  ;;  %291 = vmatprep.subr.mxu1 %v151_v21  ;;  %v110_v0 = vld [vmem:[#allocation5 + $0x210] sm:$0xff]  ;;  %v40_v1 = vld [vmem:[#allocation2] sm:$0xff]  ;;  %v43_v2 = vld [vmem:[#allocation2 + $0x18] sm:$0xff] }
  0x49   :  { %215 = vmatpush2.msra.mxu0 %v148_v22  ;;  %292 = vmatpush2.msra.mxu1 %v150_v23  ;;  %v42_v3 = vld [vmem:[#allocation2 + $0x10] sm:$0xff] }
  0x4a   :  { %216 = vmatprep.subr.mxu0 %v145_v24  ;;  %293 = vmatprep.subr.mxu1 %v147_v25 }
  0x4b   :  { %217 = vmatpush2.msra.mxu0 %v144_v26  ;;  %294 = vmatpush2.msra.mxu1 %v146_v27 }
  0x4c   :  { %218 = vmatprep.subr.mxu0 %v141_v28  ;;  %295 = vmatprep.subr.mxu1 %v143_v29 }
  0x4d   :  { %219 = vmatpush2.msra.mxu0 %v140_v30  ;;  %296 = vmatpush2.msra.mxu1 %v142_v31 }
  0x4e   :  { %220 = vmatprep.subr.mxu0 %v137_v32  ;;  %297 = vmatprep.subr.mxu1 %v139_v33 }
  0x4f   :  { %221 = vmatpush2.msra.mxu0 %v136_v34  ;;  %298 = vmatpush2.msra.mxu1 %v138_v35 }
  0x50   :  { %222 = vmatprep.subr.mxu0 %v133_v36  ;;  %299 = vmatprep.subr.mxu1 %v135_v37 }
  0x51   :  { %223 = vmatpush2.msra.mxu0 %v132_v38  ;;  %300 = vmatpush2.msra.mxu1 %v134_v39 }
  0x52   :  { %224 = vmatprep.subr.mxu0 %v129_v40  ;;  %301 = vmatprep.subr.mxu1 %v131_v41 }
  0x53   :  { %225 = vmatpush2.msra.mxu0 %v128_v42  ;;  %302 = vmatpush2.msra.mxu1 %v130_v43 }
  0x54   :  { %226 = vmatprep.subr.mxu0 %v125_v44  ;;  %303 = vmatprep.subr.mxu1 %v127_v45 }
  0x55   :  { %227 = vmatpush2.msra.mxu0 %v124_v46  ;;  %304 = vmatpush2.msra.mxu1 %v126_v47 }
  0x56   :  { %228 = vmatprep.subr.mxu0 %v121_v48  ;;  %305 = vmatprep.subr.mxu1 %v123_v49 }
  0x57   :  { %229 = vmatpush2.msra.mxu0 %v120_v50  ;;  %306 = vmatpush2.msra.mxu1 %v122_v51 }
  0x58   :  { %230 = vmatprep.subr.mxu0 %v117_v52  ;;  %307 = vmatprep.subr.mxu1 %v119_v53 }
  0x59   :  { %231 = vmatpush2.msra.mxu0 %v116_v54  ;;  %308 = vmatpush2.msra.mxu1 %v118_v55 }
  0x5a   :  { %232 = vmatprep.subr.mxu0 %v113_v56  ;;  %309 = vmatprep.subr.mxu1 %v115_v57 }
  0x5b   :  { %233 = vmatpush2.msra.mxu0 %v112_v58  ;;  %310 = vmatpush2.msra.mxu1 %v114_v59 }
  0x5c   :  { %234 = vmatprep.subr.mxu0 %v109_v60  ;;  %311 = vmatprep.subr.mxu1 %v111_v61 }
  0x5d   :  { %235 = vmatpush2.msra.mxu0 %v108_v62  ;;  %236 = vmatprep.mubr.f32.mxu0 %v41_v63 }
  0x5e   :  { %312 = vmatpush2.msra.mxu1 %v110_v0  ;;  %313 = vmatprep.mubr.f32.mxu1 %v41_v63 }
  0x5f   :  { %237 = vmatmul.mubr.f32.vlgmr.msra.gmra.mxu0 %v40_v1  ;;  %314 = vmatmul.mubr.f32.vlgmr.msra.gmra.mxu1 %v40_v1 }
  0x60   :  { %242 = vmatprep.mubr.f32.mxu0 %v43_v2  ;;  %319 = vmatprep.mubr.f32.mxu1 %v43_v2 }
  0x63   :  { %243 = vmatmul.mubr.f32.gmra.mxu0 %v42_v3  ;;  %320 = vmatmul.mubr.f32.gmra.mxu1 %v42_v3 }
 0x11f   :  { %v238_v4 = vpop.f32.mrf.mxu0  ;;  %v315_v5 = vpop.f32.mrf.mxu1 }
 0x120   :  { %326 = vst [vmem:[#allocation7] sm:$0xff] %v238_v4  ;;  %328 = vst [vmem:[#allocation7 + $0x10] sm:$0xff] %v315_v5 }
 0x121   :  { %v240_v6 = vpop.f32.mrf.mxu0  ;;  %v317_v7 = vpop.f32.mrf.mxu1 }
 0x122   :  { %327 = vst [vmem:[#allocation7 + $0x8] sm:$0xff] %v240_v6  ;;  %329 = vst [vmem:[#allocation7 + $0x18] sm:$0xff] %v317_v7 }
 0x123   :  { %v244_v8 = vpop.f32.mrf.mxu0  ;;  %v321_v9 = vpop.f32.mrf.mxu1 }
 0x124   :  { %330 = vst [vmem:[#allocation7 + $0x20] sm:$0xff] %v244_v8  ;;  %332 = vst [vmem:[#allocation7 + $0x30] sm:$0xff] %v321_v9 }
 0x125   :  { %v246_v10 = vpop.f32.mrf.mxu0  ;;  %v323_v11 = vpop.f32.mrf.mxu1 }
 0x126   :  { %331 = vst [vmem:[#allocation7 + $0x28] sm:$0xff] %v246_v10  ;;  %333 = vst [vmem:[#allocation7 + $0x38] sm:$0xff] %v323_v11 }
 0x127   :  { %410 = shalt.err (!%p407_p0)
}
 0x128   :  { %345 = dma.vmem_to_hbm [thread:$0]  %s340_s1, 1024, %s464_s2, [#allocation4], %s429_s19, %s429_s19, %s430_s20  }
 0x129   :  { %423 = dma.done.wait [#allocation4], 1024  }
 0x12a   :  { %424 = vsyncadd [#allocation4], 4294966272 }
 0x12b   :  { %349 = vsyncpa [#allocation3], 1 }
 0x12c   :  { %350 = vsyncpa [#allocation6], 1 }
 0x12d   :  { %351 = vsyncpa [#allocation4], 1 }

</bundles_post_ra>
